<compile_context>
chip_gen: v6e
topology: v6e:2x2x1
jax: 0.10.0
libtpu: 0.0.40
codegen_flags: <defaults>
</compile_context>

<pallas_src>
import functools

import jax
import jax.numpy as jnp
from jax.experimental import pallas as pl
from jax.experimental.pallas import tpu as pltpu


def _round_up(x, m):
    return (x + m - 1) // m * m


def _cdiv(a, b):
    return (a + b - 1) // b


def _default_vmem_limit_bytes():
    """Generation-aware VMEM budget: ~96 MiB on v5e/v6e, ~40 MiB on v7x."""
    cap = 128 << 20
    try:
        info = pltpu.get_tpu_info()
        cap = int(getattr(info, "vmem_capacity_bytes", cap))
    except Exception:
        pass
    if cap >= (128 << 20):
        return 96 << 20
    return max(16 << 20, (cap * 5) // 8)


def _adapter_kernel(x_ref, wa_ref, ba_ref, wb_ref, bb_ref, o_ref, *, non_linear):
    """One row tile: down-proj -> (SiLU) -> up-proj -> residual add."""
    w_dtype = wa_ref.dtype

    # Down projection on the MXU: operands in the weight dtype (matches the
    # PyTorch x.to(weight_dtype)), f32 accumulation.
    down = jnp.dot(x_ref[...].astype(w_dtype), wa_ref[...],
                   preferred_element_type=jnp.float32)
    down = down + ba_ref[...].astype(jnp.float32)

    if non_linear:
        # SiLU in f32: sigmoid on the EUP slot, multiply on the VPU.
        down = down * jax.nn.sigmoid(down)

    # TODO(synk): training-mode dropout (stochastic masking via
    # pltpu.prng_random_bits) not implemented; eval mode -> identity.

    # Up projection; activation cast back to the weight dtype for the MXU.
    up = jnp.dot(down.astype(w_dtype), wb_ref[...],
                 preferred_element_type=jnp.float32)
    up = up + bb_ref[...].astype(jnp.float32)

    # Residual: re-read x_ref here rather than keeping the input tile live
    # across both matmuls (less VMEM / vreg pressure).
    o_ref[...] = up.astype(o_ref.dtype) + x_ref[...]


def prepare_adapter_params(wa, ba, wb, bb):
    """One-time (per weight update) prep: transpose + lane-pad the hidden dim.

    wa: (H, D) = tune_adapter_a.weight, ba: (H,)
    wb: (D, H) = tune_adapter_b.weight, bb: (D,)
    Returns (Wa^T padded to (D, Hp), ba (1, Hp), Wb^T padded to (Hp, D), bb (1, D)).
    """
    H, D = wa.shape
    assert wb.shape == (D, H), (wa.shape, wb.shape)
    Hp = _round_up(H, 128)
    wa_t = jnp.pad(jnp.transpose(wa), ((0, 0), (0, Hp - H)))   # (D, Hp)
    wb_t = jnp.pad(jnp.transpose(wb), ((0, Hp - H), (0, 0)))   # (Hp, D)
    ba_p = jnp.pad(ba, (0, Hp - H)).reshape(1, Hp)
    bb_p = bb.reshape(1, D)
    return wa_t, ba_p, wb_t, bb_p


def adapter_layer_apply(x, params, *, non_linear=False, tm=None,
                        vmem_limit_bytes=None):
    """AdapterLayer forward given prepared params (see prepare_adapter_params)."""
    wa_t, ba_p, wb_t, bb_p = params
    orig_shape = x.shape
    D = orig_shape[-1]
    Hp = wa_t.shape[1]
    x2 = x.reshape(-1, D)
    N = x2.shape[0]

    w_dtype = wa_t.dtype
    w_itemsize = jnp.dtype(w_dtype).itemsize
    x_itemsize = jnp.dtype(x.dtype).itemsize
    Dp = _round_up(D, 128)   # lane-padded footprint (VMEM accounting only)

    if vmem_limit_bytes is None:
        vmem_limit_bytes = _default_vmem_limit_bytes()
    vmem_limit_bytes = int(vmem_limit_bytes)

    # --- Row-tile sizing ------------------------------------------------------
    # Weights/biases are grid-invariant; ideally single-buffered, but budget for
    # the double-buffered fallback.
    weight_bytes = 2 * (2 * Dp * Hp + Dp + Hp) * w_itemsize
    # Per row: in + out tiles (double buffered) + f32 down/up intermediates
    # + weight-dtype casts of x and down used as MXU operands.
    per_row_bytes = (4 * Dp * x_itemsize
                     + 4 * (Dp + Hp)
                     + w_itemsize * (Dp + Hp))
    budget = max(per_row_bytes * 8,
                 vmem_limit_bytes - weight_bytes - (2 << 20))
    max_tm = max(8, budget // per_row_bytes)

    row_align = 8 if x_itemsize >= 4 else (16 if x_itemsize == 2 else 32)
    if tm is None:
        tm = 512 if vmem_limit_bytes >= (64 << 20) else 256
    tm = min(tm, max_tm)
    # Keep >= ~4 grid steps so the parallel axis can feed both v7x TensorCores
    # and the pipeline has iterations to overlap.
    if N > row_align:
        tm = min(tm, max(row_align, _round_up(_cdiv(N, 4), row_align)))
    tm = min(tm, _round_up(N, row_align))        # never bigger than the input
    tm = max(row_align, (tm // row_align) * row_align)

    grid = (_cdiv(N, tm),)
    kernel = functools.partial(_adapter_kernel, non_linear=non_linear)
    compiler_params = pltpu.CompilerParams(
        dimension_semantics=("parallel",),
        vmem_limit_bytes=vmem_limit_bytes,
    )

    def run(single_buffer_weights):
        def w_spec(shape):
            # Grid-invariant operands: constant index map (no re-DMA across
            # steps); single-buffer them when supported.
            if single_buffer_weights:
                return pl.BlockSpec(shape, lambda i: (0, 0),
                                    pipeline_mode=pl.Buffered(1))
            return pl.BlockSpec(shape, lambda i: (0, 0))

        return pl.pallas_call(
            kernel,
            out_shape=jax.ShapeDtypeStruct((N, D), x.dtype),
            grid_spec=pltpu.PrefetchScalarGridSpec(
                num_scalar_prefetch=0,
                grid=grid,
                in_specs=[
                    pl.BlockSpec((tm, D), lambda i: (i, 0)),   # x row tile
                    w_spec((D, Hp)),                           # Wa^T
                    w_spec((1, Hp)),                           # ba
                    w_spec((Hp, D)),                           # Wb^T
                    w_spec((1, D)),                            # bb
                ],
                out_specs=pl.BlockSpec((tm, D), lambda i: (i, 0)),
            ),
            compiler_params=compiler_params,
        )(x2, wa_t, ba_p, wb_t, bb_p)

    try:
        out = run(single_buffer_weights=True)
    except Exception:
        # Fallback for Pallas versions that reject pipeline_mode / Buffered(1).
        out = run(single_buffer_weights=False)

    return out.reshape(orig_shape)


def adapter_layer(x, wa, ba, wb, bb, *, non_linear=False, tm=None,
                  vmem_limit_bytes=None):
    """Convenience wrapper: per-call weight prep + apply.

    For repeated calls with the same weights, call prepare_adapter_params()
    once and use adapter_layer_apply() to avoid redoing the transpose/pad.
    """
    params = prepare_adapter_params(wa, ba, wb, bb)
    return adapter_layer_apply(x, params, non_linear=non_linear, tm=tm,
                               vmem_limit_bytes=vmem_limit_bytes)


def _reference(x, wa, ba, wb, bb, non_linear=False):
    xf = x.astype(wa.dtype)
    down = jnp.dot(xf, wa.T) + ba
    if non_linear:
        down = down * jax.nn.sigmoid(down)
    up = jnp.dot(down, wb.T) + bb
    return up.astype(x.dtype) + x


if __name__ == "__main__":
    # Shapes consistent with the module: batch=2, seq=8, in_features=32, hidden_dim=8.
    B, S, D, H = 2, 8, 32, 8
    key = jax.random.PRNGKey(0)
    kx, kwa, kba, kwb, kbb = jax.random.split(key, 5)

    x = jax.random.normal(kx, (B, S, D), dtype=jnp.float32)
    wa = jax.random.normal(kwa, (H, D), dtype=jnp.float32) * 0.05  # Linear(D->H).weight
    ba = jax.random.normal(kba, (H,), dtype=jnp.float32) * 0.05
    wb = jax.random.normal(kwb, (D, H), dtype=jnp.float32) * 0.05  # Linear(H->D).weight
    bb = jax.random.normal(kbb, (D,), dtype=jnp.float32) * 0.05

    params = prepare_adapter_params(wa, ba, wb, bb)

    # Tolerances are loose enough to absorb XLA-vs-Mosaic f32 matmul precision
    # differences (default TPU f32 matmuls may use bf16 passes).
    TOL = dict(atol=1e-2, rtol=1e-2)

    # SiLU path (two low-rank matmuls fused in one kernel).
    out_nl = adapter_layer_apply(x, params, non_linear=True)
    jax.block_until_ready(out_nl)
    ref_nl = _reference(x, wa, ba, wb, bb, non_linear=True)
    assert out_nl.shape == x.shape and out_nl.dtype == x.dtype
    assert jnp.allclose(out_nl, ref_nl, **TOL), float(jnp.max(jnp.abs(out_nl - ref_nl)))

    # Identity-activation path.
    out_lin = adapter_layer_apply(x, params, non_linear=False)
    jax.block_until_ready(out_lin)
    ref_lin = _reference(x, wa, ba, wb, bb, non_linear=False)
    assert jnp.allclose(out_lin, ref_lin, **TOL), float(jnp.max(jnp.abs(out_lin - ref_lin)))

    # Ragged shapes: N not a tile multiple, D not lane-aligned.  Exercises the
    # partial last row block and masked lane stores (no host pad / slice).
    B2, S2, D2, H2 = 2, 37, 96, 8
    k2 = jax.random.split(jax.random.PRNGKey(1), 5)
    x2 = jax.random.normal(k2[0], (B2, S2, D2), dtype=jnp.float32)
    wa2 = jax.random.normal(k2[1], (H2, D2), dtype=jnp.float32) * 0.05
    ba2 = jax.random.normal(k2[2], (H2,), dtype=jnp.float32) * 0.05
    wb2 = jax.random.normal(k2[3], (D2, H2), dtype=jnp.float32) * 0.05
    bb2 = jax.random.normal(k2[4], (D2,), dtype=jnp.float32) * 0.05
    out2 = adapter_layer(x2, wa2, ba2, wb2, bb2, non_linear=True)
    jax.block_until_ready(out2)
    ref2 = _reference(x2, wa2, ba2, wb2, bb2, non_linear=True)
    assert jnp.allclose(out2, ref2, **TOL), float(jnp.max(jnp.abs(out2 - ref2)))

    print("KERNEL_OK")
</pallas_src>

<mosaic_0001>
module attributes {stable_mosaic.version = 11 : i64} {
  func.func @_adapter_kernel(%arg0: i32, %arg1: memref<8x32xf32, #tpu.memory_space<vmem>>, %arg2: memref<32x128xf32, #tpu.memory_space<vmem>>, %arg3: memref<1x128xf32, #tpu.memory_space<vmem>>, %arg4: memref<128x32xf32, #tpu.memory_space<vmem>>, %arg5: memref<1x32xf32, #tpu.memory_space<vmem>>, %arg6: memref<8x32xf32, #tpu.memory_space<vmem>>) attributes {dimension_semantics = [#tpu.dimension_semantics<parallel>], iteration_bounds = array<i64: 2>, scalar_prefetch = 0 : i64, scratch_operands = 0 : i64, tpu.core_type = #tpu.core_type<tc>, window_params = [{transform_indices = @transform_0, window_bounds = array<i64: 8, 32>}, {pipeline_mode = #tpu.pipeline_mode<synchronous>, transform_indices = @transform_1, window_bounds = array<i64: 32, 128>}, {pipeline_mode = #tpu.pipeline_mode<synchronous>, transform_indices = @transform_2, window_bounds = array<i64: 1, 128>}, {pipeline_mode = #tpu.pipeline_mode<synchronous>, transform_indices = @transform_3, window_bounds = array<i64: 128, 32>}, {pipeline_mode = #tpu.pipeline_mode<synchronous>, transform_indices = @transform_4, window_bounds = array<i64: 1, 32>}, {transform_indices = @transform_5, window_bounds = array<i64: 8, 32>}]} {
    %c0 = arith.constant 0 : index
    %c0_0 = arith.constant 0 : index
    %0 = vector.load %arg1[%c0, %c0_0] : memref<8x32xf32, #tpu.memory_space<vmem>>, vector<8x32xf32>
    %c0_1 = arith.constant 0 : index
    %c0_2 = arith.constant 0 : index
    %1 = vector.load %arg2[%c0_1, %c0_2] : memref<32x128xf32, #tpu.memory_space<vmem>>, vector<32x128xf32>
    %cst = arith.constant dense<0.000000e+00> : vector<8x128xf32>
    %2 = tpu.matmul %0, %1, %cst {dimension_numbers = #tpu.dot_dimension_numbers<[1], [0], [0], [1], [0, 0, 1, 1], [], []>} : vector<8x32xf32>, vector<32x128xf32>, vector<8x128xf32> -> vector<8x128xf32>
    %c0_3 = arith.constant 0 : index
    %c0_4 = arith.constant 0 : index
    %3 = vector.load %arg3[%c0_3, %c0_4] : memref<1x128xf32, #tpu.memory_space<vmem>>, vector<1x128xf32>
    %4 = vector.broadcast %3 : vector<1x128xf32> to vector<8x128xf32>
    %5 = arith.addf %2, %4 : vector<8x128xf32>
    %6 = arith.negf %5 : vector<8x128xf32>
    %7 = math.exp %6 : vector<8x128xf32>
    %cst_5 = arith.constant 1.000000e+00 : f32
    %8 = vector.broadcast %cst_5 : f32 to vector<8x128xf32>
    %9 = arith.addf %8, %7 : vector<8x128xf32>
    %10 = arith.divf %8, %9 : vector<8x128xf32>
    %11 = arith.mulf %5, %10 : vector<8x128xf32>
    %c0_6 = arith.constant 0 : index
    %c0_7 = arith.constant 0 : index
    %12 = vector.load %arg4[%c0_6, %c0_7] : memref<128x32xf32, #tpu.memory_space<vmem>>, vector<128x32xf32>
    %cst_8 = arith.constant dense<0.000000e+00> : vector<8x32xf32>
    %13 = tpu.matmul %11, %12, %cst_8 {dimension_numbers = #tpu.dot_dimension_numbers<[1], [0], [0], [1], [0, 0, 1, 1], [], []>} : vector<8x128xf32>, vector<128x32xf32>, vector<8x32xf32> -> vector<8x32xf32>
    %c0_9 = arith.constant 0 : index
    %c0_10 = arith.constant 0 : index
    %14 = vector.load %arg5[%c0_9, %c0_10] : memref<1x32xf32, #tpu.memory_space<vmem>>, vector<1x32xf32>
    %15 = vector.broadcast %14 : vector<1x32xf32> to vector<8x32xf32>
    %16 = arith.addf %13, %15 : vector<8x32xf32>
    %c0_11 = arith.constant 0 : index
    %c0_12 = arith.constant 0 : index
    %17 = vector.load %arg1[%c0_11, %c0_12] : memref<8x32xf32, #tpu.memory_space<vmem>>, vector<8x32xf32>
    %18 = arith.addf %16, %17 : vector<8x32xf32>
    %c0_13 = arith.constant 0 : index
    %c0_14 = arith.constant 0 : index
    %19 = vector.load %arg6[%c0_13, %c0_14] : memref<8x32xf32, #tpu.memory_space<vmem>>, vector<8x32xf32>
    tpu.vector_store %arg6[%c0_13, %c0_14], %18 {strides = array<i32>} : memref<8x32xf32, #tpu.memory_space<vmem>>, vector<8x32xf32>,
    return
  }
  func.func @transform_0(%arg0: i32) -> (i32, i32) {
    %c0_i32 = arith.constant 0 : i32
    %c0_i32_0 = arith.constant 0 : i32
    return %arg0, %c0_i32 : i32, i32
  }
  func.func @transform_1(%arg0: i32) -> (i32, i32) {
    %c0_i32 = arith.constant 0 : i32
    %c0_i32_0 = arith.constant 0 : i32
    %c0_i32_1 = arith.constant 0 : i32
    return %c0_i32, %c0_i32_0 : i32, i32
  }
  func.func @transform_2(%arg0: i32) -> (i32, i32) {
    %c0_i32 = arith.constant 0 : i32
    %c0_i32_0 = arith.constant 0 : i32
    %c0_i32_1 = arith.constant 0 : i32
    return %c0_i32, %c0_i32_0 : i32, i32
  }
  func.func @transform_3(%arg0: i32) -> (i32, i32) {
    %c0_i32 = arith.constant 0 : i32
    %c0_i32_0 = arith.constant 0 : i32
    %c0_i32_1 = arith.constant 0 : i32
    return %c0_i32, %c0_i32_0 : i32, i32
  }
  func.func @transform_4(%arg0: i32) -> (i32, i32) {
    %c0_i32 = arith.constant 0 : i32
    %c0_i32_0 = arith.constant 0 : i32
    %c0_i32_1 = arith.constant 0 : i32
    return %c0_i32, %c0_i32_0 : i32, i32
  }
  func.func @transform_5(%arg0: i32) -> (i32, i32) {
    %c0_i32 = arith.constant 0 : i32
    %c0_i32_0 = arith.constant 0 : i32
    return %arg0, %c0_i32 : i32, i32
  }
}

module attributes {stable_mosaic.version = 11 : i64} {
  func.func @_adapter_kernel(%arg0: i32, %arg1: memref<8x32xf32, #tpu.memory_space<vmem>>, %arg2: memref<32x128xf32, #tpu.memory_space<vmem>>, %arg3: memref<1x128xf32, #tpu.memory_space<vmem>>, %arg4: memref<128x32xf32, #tpu.memory_space<vmem>>, %arg5: memref<1x32xf32, #tpu.memory_space<vmem>>, %arg6: memref<8x32xf32, #tpu.memory_space<vmem>>) attributes {dimension_semantics = [#tpu.dimension_semantics<parallel>], iteration_bounds = array<i64: 2>, scalar_prefetch = 0 : i64, scratch_operands = 0 : i64, tpu.core_type = #tpu.core_type<tc>, window_params = [{transform_indices = @transform_0, window_bounds = array<i64: 8, 32>}, {pipeline_mode = #tpu.pipeline_mode<synchronous>, transform_indices = @transform_1, window_bounds = array<i64: 32, 128>}, {pipeline_mode = #tpu.pipeline_mode<synchronous>, transform_indices = @transform_2, window_bounds = array<i64: 1, 128>}, {pipeline_mode = #tpu.pipeline_mode<synchronous>, transform_indices = @transform_3, window_bounds = array<i64: 128, 32>}, {pipeline_mode = #tpu.pipeline_mode<synchronous>, transform_indices = @transform_4, window_bounds = array<i64: 1, 32>}, {transform_indices = @transform_5, window_bounds = array<i64: 8, 32>}]} {
    %c0 = arith.constant 0 : index
    %c0_0 = arith.constant 0 : index
    %0 = vector.load %arg1[%c0, %c0_0] : memref<8x32xf32, #tpu.memory_space<vmem>>, vector<8x32xf32>
    %c0_1 = arith.constant 0 : index
    %c0_2 = arith.constant 0 : index
    %1 = vector.load %arg2[%c0_1, %c0_2] : memref<32x128xf32, #tpu.memory_space<vmem>>, vector<32x128xf32>
    %cst = arith.constant dense<0.000000e+00> : vector<8x128xf32>
    %2 = tpu.matmul %0, %1, %cst {dimension_numbers = #tpu.dot_dimension_numbers<[1], [0], [0], [1], [0, 0, 1, 1], [], []>} : vector<8x32xf32>, vector<32x128xf32>, vector<8x128xf32> -> vector<8x128xf32>
    %c0_3 = arith.constant 0 : index
    %c0_4 = arith.constant 0 : index
    %3 = vector.load %arg3[%c0_3, %c0_4] : memref<1x128xf32, #tpu.memory_space<vmem>>, vector<1x128xf32>
    %4 = vector.broadcast %3 : vector<1x128xf32> to vector<8x128xf32>
    %5 = arith.addf %2, %4 : vector<8x128xf32>
    %6 = arith.negf %5 : vector<8x128xf32>
    %7 = math.exp %6 : vector<8x128xf32>
    %cst_5 = arith.constant 1.000000e+00 : f32
    %8 = vector.broadcast %cst_5 : f32 to vector<8x128xf32>
    %9 = arith.addf %8, %7 : vector<8x128xf32>
    %10 = arith.divf %8, %9 : vector<8x128xf32>
    %11 = arith.mulf %5, %10 : vector<8x128xf32>
    %c0_6 = arith.constant 0 : index
    %c0_7 = arith.constant 0 : index
    %12 = vector.load %arg4[%c0_6, %c0_7] : memref<128x32xf32, #tpu.memory_space<vmem>>, vector<128x32xf32>
    %cst_8 = arith.constant dense<0.000000e+00> : vector<8x32xf32>
    %13 = tpu.matmul %11, %12, %cst_8 {dimension_numbers = #tpu.dot_dimension_numbers<[1], [0], [0], [1], [0, 0, 1, 1], [], []>} : vector<8x128xf32>, vector<128x32xf32>, vector<8x32xf32> -> vector<8x32xf32>
    %c0_9 = arith.constant 0 : index
    %c0_10 = arith.constant 0 : index
    %14 = vector.load %arg5[%c0_9, %c0_10] : memref<1x32xf32, #tpu.memory_space<vmem>>, vector<1x32xf32>
    %15 = vector.broadcast %14 : vector<1x32xf32> to vector<8x32xf32>
    %16 = arith.addf %13, %15 : vector<8x32xf32>
    %c0_11 = arith.constant 0 : index
    %c0_12 = arith.constant 0 : index
    %17 = vector.load %arg1[%c0_11, %c0_12] : memref<8x32xf32, #tpu.memory_space<vmem>>, vector<8x32xf32>
    %18 = arith.addf %16, %17 : vector<8x32xf32>
    %c0_13 = arith.constant 0 : index
    %c0_14 = arith.constant 0 : index
    %19 = vector.load %arg6[%c0_13, %c0_14] : memref<8x32xf32, #tpu.memory_space<vmem>>, vector<8x32xf32>
    tpu.vector_store %arg6[%c0_13, %c0_14], %18 {strides = array<i32>} : memref<8x32xf32, #tpu.memory_space<vmem>>, vector<8x32xf32>,
    return
  }
  func.func @transform_0(%arg0: i32) -> (i32, i32) {
    %c0_i32 = arith.constant 0 : i32
    %c0_i32_0 = arith.constant 0 : i32
    return %arg0, %c0_i32 : i32, i32
  }
  func.func @transform_1(%arg0: i32) -> (i32, i32) {
    %c0_i32 = arith.constant 0 : i32
    %c0_i32_0 = arith.constant 0 : i32
    %c0_i32_1 = arith.constant 0 : i32
    return %c0_i32, %c0_i32_0 : i32, i32
  }
  func.func @transform_2(%arg0: i32) -> (i32, i32) {
    %c0_i32 = arith.constant 0 : i32
    %c0_i32_0 = arith.constant 0 : i32
    %c0_i32_1 = arith.constant 0 : i32
    return %c0_i32, %c0_i32_0 : i32, i32
  }
  func.func @transform_3(%arg0: i32) -> (i32, i32) {
    %c0_i32 = arith.constant 0 : i32
    %c0_i32_0 = arith.constant 0 : i32
    %c0_i32_1 = arith.constant 0 : i32
    return %c0_i32, %c0_i32_0 : i32, i32
  }
  func.func @transform_4(%arg0: i32) -> (i32, i32) {
    %c0_i32 = arith.constant 0 : i32
    %c0_i32_0 = arith.constant 0 : i32
    %c0_i32_1 = arith.constant 0 : i32
    return %c0_i32, %c0_i32_0 : i32, i32
  }
  func.func @transform_5(%arg0: i32) -> (i32, i32) {
    %c0_i32 = arith.constant 0 : i32
    %c0_i32_0 = arith.constant 0 : i32
    return %arg0, %c0_i32 : i32, i32
  }
}

</mosaic_0001>

<bundles_post_ra>
// kernel: tpu_custom_call.1
= control target key start
LH: loop header
LB: loop body
LE: loop exit
PB: predicated region body
PF: predicated region fallthrough
CT: control target
= control target key end

     0   :  { %10 = vsyncpa [#allocation3], 0  ;;  %s884_s0 = inlined_call_operand.vmem [shape: f32[16,32], index: 0, kind: input, shape index: {}]   ;;  %s885_s1 = inlined_call_operand.vmem [shape: f32[32,128], index: 1, kind: input, shape index: {}]   ;;  %s886_s2 = inlined_call_operand.vmem [shape: f32[1,128], index: 2, kind: input, shape index: {}]   ;;  %s887_s3 = inlined_call_operand.vmem [shape: f32[128,32], index: 3, kind: input, shape index: {}]   ;;  %s888_s4 = inlined_call_operand.vmem [shape: f32[1,32], index: 4, kind: input, shape index: {}]   ;;  %s889_s5 = inlined_call_operand.hbm [shape: f32[16,32], index: 5, kind: output, shape index: {}]  }
   0x1   :  { %12 = vsyncpa [#allocation3 + $0x1], 0  ;;  %s703_s18 = smov 0   ;;  %s705_s19 = smov 0  }
   0x2   :  { %s707_s20 = smov 0   ;;  %s709_s21 = smov 0  }
   0x3 LB: > { %s724_s22 = sadd.s32 4294967295, %s668_s21   ;;  %s481_s23 = sadd.s32 4294967294, %s668_s21   ;;  %s668_s21 = sphi %s709_s21, %s895_s21   ;;  %s664_s20 = sphi %s707_s20, %s894_s20   ;;  %s660_s19 = sphi %s705_s19, %s893_s19   ;;  %s656_s18 = sphi %s703_s18, %s892_s18  }
   0x4   : > { %s728_s24 = sadd.s32 1, %s668_s21   ;;  %s135_s25 = sadd.s32 1, %s664_s20 }
   0x5   : > { %s132_s26 = ssub.s32 %s668_s21, %s728_s24  ;;  %p145_p0 = scmp.ne.s32.totalorder %s664_s20, %s660_s19 }
   0x6   : > { %p133_p1 = scmp.eq.s32.totalorder %s132_s26, 0  ;;  %p146_p2 = scmp.eq.s32.totalorder %s724_s22, 1 }
   0x7   : > { %p151_p3 = scmp.ne.s32.totalorder %s660_s19, %s656_s18  ;;  %p152_p4 = scmp.eq.s32.totalorder %s481_s23, 1 }
   0x8   : > { %s739_s27 = scalar_select %p133_p1, %s664_s20, %s135_s25  }
   0x9   : > { %p741_p5 = por %p146_p2, %p145_p0  ;;  %p745_p6 = por %p152_p4, %p151_p3 }
   0xa   : > { %p484_p7 = scmp.ge.s32.totalorder %s668_s21, 1  ;;  %p189_p8 = scmp.lt.s32.totalorder %s668_s21, 3 }
   0xc   : > { %p190_p9 = pnand %p484_p7, %p189_p8 }
   0xd   : > { %p216_p10 = scmp.lt.s32.totalorder (!%p190_p9), %s724_s22, 1  ;;  %s213_s26 = sand.u32 (!%p190_p9), 1, %s660_s19  }
   0xe   : > { %193 = sbr.rel (%p190_p9) target bundleno = 467 (0x1d3), region = 40  ;;  %s485_s30 = sshll.u32 (!%p190_p9), %s213_s26, 3 }
   0xf   : > { %s492_s8 = sshll.u32 (!%p190_p9), %s724_s22, 7  ;;  %s409_s14 = scalar_lea.sflag (!%p190_p9), [#allocation3], %s213_s26 }
  0x10   : > { %s420_s13 = scalar_lea.hbm (!%p190_p9), %s889_s5, %s492_s8 }
  0x13   : > { %v224_v0 = vld [vmem:[%s885_s1 + $0x18] sm:$0xff]  ;;  %v670_v1 = vmov 0.0   ;;  %v223_v2 = vld [vmem:[%s885_s1 + $0x10] sm:$0xff]  ;;  %vm671_vm0 = vmmov 0   ;;  %s217_s9 = scalar_select %p216_p10, %s724_s22, 1  ;;  %v222_v3 = vld [vmem:[%s885_s1 + $0x8] sm:$0xff] }
  0x14   : > { %517 = vmatprep.subr.mxu0 %v670_v1  ;;  %525 = vmatprep.mubr.msk.f32.mxu0 %vm671_vm0, %v670_v1  ;;  %v221_v4 = vld [vmem:[%s885_s1] sm:$0xff]  ;;  %vm232_vm1 = vcmask 261120   ;;  %v328_v6 = vld [vmem:[%s887_s3 + $0x78] sm:$0xff]  ;;  %v327_v7 = vld [vmem:[%s887_s3 + $0x70] sm:$0xff]  ;;  %s672_s22 = smov [#allocation2]  }
  0x15   : > { %518 = vmatpush3.msra.mxu0 %v224_v0  ;;  %528 = vmatprep.subr.mxu1 %v670_v1  ;;  %s486_s12 = sshll.u32 %s217_s9, 3  ;;  %v326_v8 = vld [vmem:[%s887_s3 + $0x68] sm:$0xff]  ;;  %v325_v9 = vld [vmem:[%s887_s3 + $0x60] sm:$0xff]  ;;  %v324_v10 = vld [vmem:[%s887_s3 + $0x58] sm:$0xff]  ;;  %s215_s9 = scalar_lea.vmem [#allocation2], %s485_s30 }
  0x16   : > { %519 = vmatprep.subr.mxu0 %v670_v1  ;;  %560 = vmatprep.mubr.msk.f32.mxu1 %vm671_vm0, %v670_v1  ;;  %s219_s17 = scalar_lea.vmem %s884_s0, %s486_s12  ;;  %v323_v11 = vld [vmem:[%s887_s3 + $0x50] sm:$0xff]  ;;  %v322_v12 = vld [vmem:[%s887_s3 + $0x48] sm:$0xff]  ;;  %v321_v13 = vld [vmem:[%s887_s3 + $0x40] sm:$0xff]  ;;  %s422_s10 = sshll.u32 %s215_s9, 4  ;;  %s423_s10 = int_to_ptr.vmem [resolvable:$true] %s422_s10 }
  0x17   : > { %520 = vmatpush3.msra.mxu0 %v223_v2  ;;  %v774_v5 = vld [vmem:[%s219_s17] sm:$0xff]  ;;  %529 = vmatpush3.msra.mxu1 %v328_v6  ;;  %v320_v14 = vld [vmem:[%s887_s3 + $0x38] sm:$0xff]  ;;  %v319_v15 = vld [vmem:[%s887_s3 + $0x30] sm:$0xff]  ;;  %s608_s15 = scalar_lea.vmem %s423_s10, 128  ;;  %s612_s16 = sshll.u32 %s672_s22, 4  ;;  %s613_s16 = int_to_ptr.vmem [resolvable:$false] %s612_s16 }
  0x18   : > { %521 = vmatprep.subr.mxu0 %v670_v1  ;;  %530 = vmatprep.subr.mxu1 %v670_v1  ;;  %v318_v16 = vld [vmem:[%s887_s3 + $0x28] sm:$0xff]  ;;  %v317_v17 = vld [vmem:[%s887_s3 + $0x20] sm:$0xff]  ;;  %v316_v18 = vld [vmem:[%s887_s3 + $0x18] sm:$0xff]  ;;  %p609_p11 = scmp.ne.s32.totalorder %s423_s10, %s608_s15  ;;  %s614_s17 = scalar_lea.vmem %s613_s16, 256 }
  0x19   : > { %522 = vmatpush3.msra.mxu0 %v222_v3  ;;  %531 = vmatpush3.msra.mxu1 %v327_v7  ;;  %v315_v19 = vld [vmem:[%s887_s3 + $0x10] sm:$0xff]  ;;  %v314_v20 = vld [vmem:[%s887_s3 + $0x8] sm:$0xff]  ;;  %v313_v21 = vld [vmem:[%s887_s3] sm:$0xff]  ;;  %p615_p0 = scmp.lt.s32.totalorder %s423_s10, %s613_s16  ;;  %p616_p1 = scmp.lt.s32.totalorder %s614_s17, %s608_s15 }
  0x1a   : > { %523 = vmatprep.subr.mxu0 %v670_v1  ;;  %532 = vmatprep.subr.mxu1 %v670_v1  ;;  %v487_v22 = vld [vmem:[%s886_s2] ss:$0 sm:$0xff]  ;;  %p610_p12 = pnand %p609_p11, %p741_p5 }
  0x1b   : > { %524 = vmatpush3.msra.mxu0 %v221_v4  ;;  %533 = vmatpush3.msra.mxu1 %v326_v8  ;;  %v490_v31 = vld [vmem:[%s888_s4] ss:$0 sm:$0xff]  ;;  %p617_p2 = por %p616_p1, %p615_p0 }
  0x1c   : > { %526 = vmatmul.mubr.msk.f32.vlgmr.msra.gmra.mxu0 %vm232_vm1, %v774_v5  ;;  %534 = vmatprep.subr.mxu1 %v670_v1  ;;  %p611_p13 = pneg %p610_p12 }
  0x1d   : > { %535 = vmatpush3.msra.mxu1 %v325_v9 }
  0x1e   : > { %536 = vmatprep.subr.mxu1 %v670_v1  ;;  %p618_p3 = pnand %p617_p2, %p611_p13 }
  0x1f   : > { %537 = vmatpush3.msra.mxu1 %v324_v10 }
  0x20   : > { %538 = vmatprep.subr.mxu1 %v670_v1 }
  0x21   : > { %539 = vmatpush3.msra.mxu1 %v323_v11 }
  0x22   : > { %540 = vmatprep.subr.mxu1 %v670_v1 }
  0x23   : > { %541 = vmatpush3.msra.mxu1 %v322_v12 }
  0x24   : > { %542 = vmatprep.subr.mxu1 %v670_v1 }
  0x25   : > { %543 = vmatpush3.msra.mxu1 %v321_v13 }
  0x26   : > { %544 = vmatprep.subr.mxu1 %v670_v1 }
  0x27   : > { %545 = vmatpush3.msra.mxu1 %v320_v14 }
  0x28   : > { %546 = vmatprep.subr.mxu1 %v670_v1 }
  0x29   : > { %547 = vmatpush3.msra.mxu1 %v319_v15 }
  0x2a   : > { %548 = vmatprep.subr.mxu1 %v670_v1 }
  0x2b   : > { %549 = vmatpush3.msra.mxu1 %v318_v16 }
  0x2c   : > { %550 = vmatprep.subr.mxu1 %v670_v1 }
  0x2d   : > { %551 = vmatpush3.msra.mxu1 %v317_v17 }
  0x2e   : > { %552 = vmatprep.subr.mxu1 %v670_v1 }
  0x2f   : > { %553 = vmatpush3.msra.mxu1 %v316_v18 }
  0x30   : > { %554 = vmatprep.subr.mxu1 %v670_v1 }
  0x31   : > { %555 = vmatpush3.msra.mxu1 %v315_v19 }
  0x32   : > { %556 = vmatprep.subr.mxu1 %v670_v1 }
  0x33   : > { %557 = vmatpush3.msra.mxu1 %v314_v20 }
  0x34   : > { %558 = vmatprep.subr.mxu1 %v670_v1 }
  0x35   : > { %559 = vmatpush3.msra.mxu1 %v313_v21 }
  0xdc   : > { %v302_v23 = vpop.f32.mrf.mxu0 }
  0xdd   : > { %v303_v24 = vadd.f32 %v487_v22, %v302_v23 }
  0xde   : > { %v527_v25 = vpop.f32.mrf.mxu0 }
  0xdf   : > { %v489_v26 = vmul.f32 -1.442695, %v303_v24 }
  0xe1   : > { %604 = vpow2.f32 %v489_v26 }
  0xee   : > { %v605_v27 = vpop.eup %604 }
  0xef   : > { %v309_v28 = vadd.f32 1.0, %v605_v27 }
  0xf1   : > { %606 = vrcp.f32 %v309_v28 }
  0xfe   : > { %v607_v29 = vpop.eup %606 }
  0xff   : > { %v312_v30 = vmul.f32 %v607_v29, %v303_v24 }
 0x101   : > { %561 = vmatmul.mubr.f32.vlgmr.msra.gmra.mxu1 %v312_v30 }
 0x1c1   : > { %v402_v32 = vpop.f32.mrf.mxu1 }
 0x1c2   : > { %v403_v33 = vadd.f32 %v490_v31, %v402_v32 }
 0x1c3   : > { %v562_v34 = vpop.f32.mrf.mxu1 }
 0x1c4   : > { %v406_v35 = vadd.f32 %v403_v33, %v774_v5 }
 0x1c6   : > { %407 = vst.msk [vmem:[%s215_s9] sm:$0xff] %vm232_vm1, %v406_v35 }
 0x1c7   : > { %621 = shalt.err (!%p618_p3)
}
 0x1c8   : > { %s622_s23 = scalar_lea.hbm %s420_s13, 128  ;;  %s626_s30 = scalar_lea.hbm %s889_s5, 256 }
 0x1c9   : > { %p623_p4 = scmp.ne.s32.totalorder %s420_s13, %s622_s23  ;;  %p627_p9 = scmp.lt.s32.totalorder %s420_s13, %s889_s5 }
 0x1ca   : > { %p628_p10 = scmp.lt.s32.totalorder %s626_s30, %s622_s23 }
 0x1cb   : > { %p624_p7 = pnand %p623_p4, %p741_p5 }
 0x1cc   : > { %p629_p11 = por %p628_p10, %p627_p9 }
 0x1cd   : > { %p625_p8 = pneg %p624_p7 }
 0x1cf   : > { %p630_p12 = pnand %p629_p11, %p625_p8 }
 0x1d1   : > { %633 = shalt.err (!%p630_p12)
}
 0x1d2   : > { %563 = dma.vmem_to_hbm [thread:$0]  (%p741_p5), %s423_s10, 128, %s420_s13, %s409_s14  }
 0x1d3 PF: > { %p569_p13 = scmp.ge.s32.totalorder %s668_s21, 2  ;;  %s434_s8 = sand.u32 1, %s656_s18  }
 0x1d4   : > { %s435_s9 = scalar_lea.sflag [#allocation3], %s434_s8 }
 0x1d5   : > { %p566_p0 = pnand %p569_p13, %p745_p6 }
 0x1d7   : > { %p567_p1 = pneg %p566_p0 }
 0x1d9   : > { %651 = dma.done.wait (%p567_p1), %s435_s9, 128  }
 0x1da   : > { %653 = vsyncadd (%p567_p1), %s435_s9, 4294967168  ;;  %p15_p2 = scmp.ge.s32.totalorder %s728_s24, 4   ;;  %s892_s18 = smov %s660_s19 }
 0x1db   : > { %s893_s19 = smov %s664_s20  ;;  %s894_s20 = smov %s739_s27 }
 0x1dc   : > { %s895_s21 = smov %s728_s24  ;;  %17 = sbr.rel (!%p15_p2) target bundleno = 3 (0x3), region = 75 }
 0x1e1   :  { %440 = vsyncpa [#allocation3], 1 }
 0x1e2   :  { %442 = vsyncpa [#allocation3 + $0x1], 1 }

// kernel: tpu_custom_call.1
= control target key start
LH: loop header
LB: loop body
LE: loop exit
PB: predicated region body
PF: predicated region fallthrough
CT: control target
= control target key end

     0   :  { %10 = vsyncpa [#allocation3], 0  ;;  %s884_s0 = inlined_call_operand.vmem [shape: f32[16,32], index: 0, kind: input, shape index: {}]   ;;  %s885_s1 = inlined_call_operand.vmem [shape: f32[32,128], index: 1, kind: input, shape index: {}]   ;;  %s886_s2 = inlined_call_operand.vmem [shape: f32[1,128], index: 2, kind: input, shape index: {}]   ;;  %s887_s3 = inlined_call_operand.vmem [shape: f32[128,32], index: 3, kind: input, shape index: {}]   ;;  %s888_s4 = inlined_call_operand.vmem [shape: f32[1,32], index: 4, kind: input, shape index: {}]   ;;  %s889_s5 = inlined_call_operand.hbm [shape: f32[16,32], index: 5, kind: output, shape index: {}]  }
   0x1   :  { %12 = vsyncpa [#allocation3 + $0x1], 0  ;;  %s703_s18 = smov 0   ;;  %s705_s19 = smov 0  }
   0x2   :  { %s707_s20 = smov 0   ;;  %s709_s21 = smov 0  }
   0x3 LB: > { %s724_s22 = sadd.s32 4294967295, %s668_s21   ;;  %s481_s23 = sadd.s32 4294967294, %s668_s21   ;;  %s668_s21 = sphi %s709_s21, %s895_s21   ;;  %s664_s20 = sphi %s707_s20, %s894_s20   ;;  %s660_s19 = sphi %s705_s19, %s893_s19   ;;  %s656_s18 = sphi %s703_s18, %s892_s18  }
   0x4   : > { %s728_s24 = sadd.s32 1, %s668_s21   ;;  %s135_s25 = sadd.s32 1, %s664_s20 }
   0x5   : > { %s132_s26 = ssub.s32 %s668_s21, %s728_s24  ;;  %p145_p0 = scmp.ne.s32.totalorder %s664_s20, %s660_s19 }
   0x6   : > { %p133_p1 = scmp.eq.s32.totalorder %s132_s26, 0  ;;  %p146_p2 = scmp.eq.s32.totalorder %s724_s22, 1 }
   0x7   : > { %p151_p3 = scmp.ne.s32.totalorder %s660_s19, %s656_s18  ;;  %p152_p4 = scmp.eq.s32.totalorder %s481_s23, 1 }
   0x8   : > { %s739_s27 = scalar_select %p133_p1, %s664_s20, %s135_s25  }
   0x9   : > { %p741_p5 = por %p146_p2, %p145_p0  ;;  %p745_p6 = por %p152_p4, %p151_p3 }
   0xa   : > { %p484_p7 = scmp.ge.s32.totalorder %s668_s21, 1  ;;  %p189_p8 = scmp.lt.s32.totalorder %s668_s21, 3 }
   0xc   : > { %p190_p9 = pnand %p484_p7, %p189_p8 }
   0xd   : > { %p216_p10 = scmp.lt.s32.totalorder (!%p190_p9), %s724_s22, 1  ;;  %s213_s26 = sand.u32 (!%p190_p9), 1, %s660_s19  }
   0xe   : > { %193 = sbr.rel (%p190_p9) target bundleno = 467 (0x1d3), region = 40  ;;  %s485_s30 = sshll.u32 (!%p190_p9), %s213_s26, 3 }
   0xf   : > { %s492_s8 = sshll.u32 (!%p190_p9), %s724_s22, 7  ;;  %s409_s14 = scalar_lea.sflag (!%p190_p9), [#allocation3], %s213_s26 }
  0x10   : > { %s420_s13 = scalar_lea.hbm (!%p190_p9), %s889_s5, %s492_s8 }
  0x13   : > { %v224_v0 = vld [vmem:[%s885_s1 + $0x18] sm:$0xff]  ;;  %v670_v1 = vmov 0.0   ;;  %v223_v2 = vld [vmem:[%s885_s1 + $0x10] sm:$0xff]  ;;  %vm671_vm0 = vmmov 0   ;;  %s217_s9 = scalar_select %p216_p10, %s724_s22, 1  ;;  %v222_v3 = vld [vmem:[%s885_s1 + $0x8] sm:$0xff] }
  0x14   : > { %517 = vmatprep.subr.mxu0 %v670_v1  ;;  %525 = vmatprep.mubr.msk.f32.mxu0 %vm671_vm0, %v670_v1  ;;  %v221_v4 = vld [vmem:[%s885_s1] sm:$0xff]  ;;  %vm232_vm1 = vcmask 261120   ;;  %v328_v6 = vld [vmem:[%s887_s3 + $0x78] sm:$0xff]  ;;  %v327_v7 = vld [vmem:[%s887_s3 + $0x70] sm:$0xff]  ;;  %s672_s22 = smov [#allocation2]  }
  0x15   : > { %518 = vmatpush3.msra.mxu0 %v224_v0  ;;  %528 = vmatprep.subr.mxu1 %v670_v1  ;;  %s486_s12 = sshll.u32 %s217_s9, 3  ;;  %v326_v8 = vld [vmem:[%s887_s3 + $0x68] sm:$0xff]  ;;  %v325_v9 = vld [vmem:[%s887_s3 + $0x60] sm:$0xff]  ;;  %v324_v10 = vld [vmem:[%s887_s3 + $0x58] sm:$0xff]  ;;  %s215_s9 = scalar_lea.vmem [#allocation2], %s485_s30 }
  0x16   : > { %519 = vmatprep.subr.mxu0 %v670_v1  ;;  %560 = vmatprep.mubr.msk.f32.mxu1 %vm671_vm0, %v670_v1  ;;  %s219_s17 = scalar_lea.vmem %s884_s0, %s486_s12  ;;  %v323_v11 = vld [vmem:[%s887_s3 + $0x50] sm:$0xff]  ;;  %v322_v12 = vld [vmem:[%s887_s3 + $0x48] sm:$0xff]  ;;  %v321_v13 = vld [vmem:[%s887_s3 + $0x40] sm:$0xff]  ;;  %s422_s10 = sshll.u32 %s215_s9, 4  ;;  %s423_s10 = int_to_ptr.vmem [resolvable:$true] %s422_s10 }
  0x17   : > { %520 = vmatpush3.msra.mxu0 %v223_v2  ;;  %v774_v5 = vld [vmem:[%s219_s17] sm:$0xff]  ;;  %529 = vmatpush3.msra.mxu1 %v328_v6  ;;  %v320_v14 = vld [vmem:[%s887_s3 + $0x38] sm:$0xff]  ;;  %v319_v15 = vld [vmem:[%s887_s3 + $0x30] sm:$0xff]  ;;  %s608_s15 = scalar_lea.vmem %s423_s10, 128  ;;  %s612_s16 = sshll.u32 %s672_s22, 4  ;;  %s613_s16 = int_to_ptr.vmem [resolvable:$false] %s612_s16 }
  0x18   : > { %521 = vmatprep.subr.mxu0 %v670_v1  ;;  %530 = vmatprep.subr.mxu1 %v670_v1  ;;  %v318_v16 = vld [vmem:[%s887_s3 + $0x28] sm:$0xff]  ;;  %v317_v17 = vld [vmem:[%s887_s3 + $0x20] sm:$0xff]  ;;  %v316_v18 = vld [vmem:[%s887_s3 + $0x18] sm:$0xff]  ;;  %p609_p11 = scmp.ne.s32.totalorder %s423_s10, %s608_s15  ;;  %s614_s17 = scalar_lea.vmem %s613_s16, 256 }
  0x19   : > { %522 = vmatpush3.msra.mxu0 %v222_v3  ;;  %531 = vmatpush3.msra.mxu1 %v327_v7  ;;  %v315_v19 = vld [vmem:[%s887_s3 + $0x10] sm:$0xff]  ;;  %v314_v20 = vld [vmem:[%s887_s3 + $0x8] sm:$0xff]  ;;  %v313_v21 = vld [vmem:[%s887_s3] sm:$0xff]  ;;  %p615_p0 = scmp.lt.s32.totalorder %s423_s10, %s613_s16  ;;  %p616_p1 = scmp.lt.s32.totalorder %s614_s17, %s608_s15 }
  0x1a   : > { %523 = vmatprep.subr.mxu0 %v670_v1  ;;  %532 = vmatprep.subr.mxu1 %v670_v1  ;;  %v487_v22 = vld [vmem:[%s886_s2] ss:$0 sm:$0xff]  ;;  %p610_p12 = pnand %p609_p11, %p741_p5 }
  0x1b   : > { %524 = vmatpush3.msra.mxu0 %v221_v4  ;;  %533 = vmatpush3.msra.mxu1 %v326_v8  ;;  %v490_v31 = vld [vmem:[%s888_s4] ss:$0 sm:$0xff]  ;;  %p617_p2 = por %p616_p1, %p615_p0 }
  0x1c   : > { %526 = vmatmul.mubr.msk.f32.vlgmr.msra.gmra.mxu0 %vm232_vm1, %v774_v5  ;;  %534 = vmatprep.subr.mxu1 %v670_v1  ;;  %p611_p13 = pneg %p610_p12 }
  0x1d   : > { %535 = vmatpush3.msra.mxu1 %v325_v9 }
  0x1e   : > { %536 = vmatprep.subr.mxu1 %v670_v1  ;;  %p618_p3 = pnand %p617_p2, %p611_p13 }
  0x1f   : > { %537 = vmatpush3.msra.mxu1 %v324_v10 }
  0x20   : > { %538 = vmatprep.subr.mxu1 %v670_v1 }
  0x21   : > { %539 = vmatpush3.msra.mxu1 %v323_v11 }
  0x22   : > { %540 = vmatprep.subr.mxu1 %v670_v1 }
  0x23   : > { %541 = vmatpush3.msra.mxu1 %v322_v12 }
  0x24   : > { %542 = vmatprep.subr.mxu1 %v670_v1 }
  0x25   : > { %543 = vmatpush3.msra.mxu1 %v321_v13 }
  0x26   : > { %544 = vmatprep.subr.mxu1 %v670_v1 }
  0x27   : > { %545 = vmatpush3.msra.mxu1 %v320_v14 }
  0x28   : > { %546 = vmatprep.subr.mxu1 %v670_v1 }
  0x29   : > { %547 = vmatpush3.msra.mxu1 %v319_v15 }
  0x2a   : > { %548 = vmatprep.subr.mxu1 %v670_v1 }
  0x2b   : > { %549 = vmatpush3.msra.mxu1 %v318_v16 }
  0x2c   : > { %550 = vmatprep.subr.mxu1 %v670_v1 }
  0x2d   : > { %551 = vmatpush3.msra.mxu1 %v317_v17 }
  0x2e   : > { %552 = vmatprep.subr.mxu1 %v670_v1 }
  0x2f   : > { %553 = vmatpush3.msra.mxu1 %v316_v18 }
  0x30   : > { %554 = vmatprep.subr.mxu1 %v670_v1 }
  0x31   : > { %555 = vmatpush3.msra.mxu1 %v315_v19 }
  0x32   : > { %556 = vmatprep.subr.mxu1 %v670_v1 }
  0x33   : > { %557 = vmatpush3.msra.mxu1 %v314_v20 }
  0x34   : > { %558 = vmatprep.subr.mxu1 %v670_v1 }
  0x35   : > { %559 = vmatpush3.msra.mxu1 %v313_v21 }
  0xdc   : > { %v302_v23 = vpop.f32.mrf.mxu0 }
  0xdd   : > { %v303_v24 = vadd.f32 %v487_v22, %v302_v23 }
  0xde   : > { %v527_v25 = vpop.f32.mrf.mxu0 }
  0xdf   : > { %v489_v26 = vmul.f32 -1.442695, %v303_v24 }
  0xe1   : > { %604 = vpow2.f32 %v489_v26 }
  0xee   : > { %v605_v27 = vpop.eup %604 }
  0xef   : > { %v309_v28 = vadd.f32 1.0, %v605_v27 }
  0xf1   : > { %606 = vrcp.f32 %v309_v28 }
  0xfe   : > { %v607_v29 = vpop.eup %606 }
  0xff   : > { %v312_v30 = vmul.f32 %v607_v29, %v303_v24 }
 0x101   : > { %561 = vmatmul.mubr.f32.vlgmr.msra.gmra.mxu1 %v312_v30 }
 0x1c1   : > { %v402_v32 = vpop.f32.mrf.mxu1 }
 0x1c2   : > { %v403_v33 = vadd.f32 %v490_v31, %v402_v32 }
 0x1c3   : > { %v562_v34 = vpop.f32.mrf.mxu1 }
 0x1c4   : > { %v406_v35 = vadd.f32 %v403_v33, %v774_v5 }
 0x1c6   : > { %407 = vst.msk [vmem:[%s215_s9] sm:$0xff] %vm232_vm1, %v406_v35 }
 0x1c7   : > { %621 = shalt.err (!%p618_p3)
}
 0x1c8   : > { %s622_s23 = scalar_lea.hbm %s420_s13, 128  ;;  %s626_s30 = scalar_lea.hbm %s889_s5, 256 }
 0x1c9   : > { %p623_p4 = scmp.ne.s32.totalorder %s420_s13, %s622_s23  ;;  %p627_p9 = scmp.lt.s32.totalorder %s420_s13, %s889_s5 }
 0x1ca   : > { %p628_p10 = scmp.lt.s32.totalorder %s626_s30, %s622_s23 }
 0x1cb   : > { %p624_p7 = pnand %p623_p4, %p741_p5 }
 0x1cc   : > { %p629_p11 = por %p628_p10, %p627_p9 }
 0x1cd   : > { %p625_p8 = pneg %p624_p7 }
 0x1cf   : > { %p630_p12 = pnand %p629_p11, %p625_p8 }
 0x1d1   : > { %633 = shalt.err (!%p630_p12)
}
 0x1d2   : > { %563 = dma.vmem_to_hbm [thread:$0]  (%p741_p5), %s423_s10, 128, %s420_s13, %s409_s14  }
 0x1d3 PF: > { %p569_p13 = scmp.ge.s32.totalorder %s668_s21, 2  ;;  %s434_s8 = sand.u32 1, %s656_s18  }
 0x1d4   : > { %s435_s9 = scalar_lea.sflag [#allocation3], %s434_s8 }
 0x1d5   : > { %p566_p0 = pnand %p569_p13, %p745_p6 }
 0x1d7   : > { %p567_p1 = pneg %p566_p0 }
 0x1d9   : > { %651 = dma.done.wait (%p567_p1), %s435_s9, 128  }
 0x1da   : > { %653 = vsyncadd (%p567_p1), %s435_s9, 4294967168  ;;  %p15_p2 = scmp.ge.s32.totalorder %s728_s24, 4   ;;  %s892_s18 = smov %s660_s19 }
 0x1db   : > { %s893_s19 = smov %s664_s20  ;;  %s894_s20 = smov %s739_s27 }
 0x1dc   : > { %s895_s21 = smov %s728_s24  ;;  %17 = sbr.rel (!%p15_p2) target bundleno = 3 (0x3), region = 75 }
 0x1e1   :  { %440 = vsyncpa [#allocation3], 1 }
 0x1e2   :  { %442 = vsyncpa [#allocation3 + $0x1], 1 }

</bundles_post_ra>
